<compile_context>
chip_gen: v7x
topology: tpu7x:2x2x1
jax: 0.10.0
libtpu: 0.0.40
codegen_flags: <defaults>
</compile_context>

<pallas_src>
import jax
import jax.numpy as jnp
import numpy as np
from jax.experimental import pallas as pl
from jax.experimental.pallas import tpu as pltpu

EPS = 1e-5


def convblock_kernel(x1_ref, t1_ref, t2_ref, kmat_ref, gb1_ref, gb2_ref,
                     out_ref, h1p_ref):
    # x1_ref  : (N*H, 3*W*Cin) bf16   conv1 input, 3x3 kh taps already K-stacked
    # t1_ref  : (3*W*Cin, W*C1) bf16  banded block-Toeplitz conv1 weights (kh-stacked on K)
    # t2_ref  : (3*W*C1, W*C2) bf16   conv2 weights (kh-stacked on K)
    # kmat_ref: (W*C, W*C)      f32   per-channel group-mean matrix, prescaled 1/(N*H*W)
    # gb*_ref : (2, W*C)        f32   row 0 = gamma (tiled over w), row 1 = beta
    # out_ref : (N*H, W*C2)     f32   lane-dense output slab
    # h1p_ref : (N, H+2, W*C1)  f32   VMEM scratch, H halo only
    N, Hp, CW1 = h1p_ref.shape
    H = Hp - 2
    CW2 = out_ref.shape[-1]
    M = N * H

    def bn_scale_shift(y, gb):
        # One-pass sum / sum-of-squares over the stacked (N*H, CW) slab, then a
        # single (2,CW) x (CW,CW) matmul reduces over w -> per-channel stats.
        s = jnp.sum(y, axis=0, keepdims=True)
        q = jnp.sum(y * y, axis=0, keepdims=True)
        stats = jnp.dot(jnp.concatenate([s, q], axis=0), kmat_ref[...],
                        preferred_element_type=jnp.float32)
        mean = stats[0:1, :]
        var = stats[1:2, :] - mean * mean  # TODO(synk): two-pass variance at scale
        scale = gb[0:1, :] * jax.lax.rsqrt(var + EPS)
        shift = gb[1:2, :] - mean * scale
        return scale, shift

    # ---------------- conv1: one batched K-stacked MXU matmul ----------------
    y1 = jnp.dot(x1_ref[...], t1_ref[...], preferred_element_type=jnp.float32)

    # -------- BatchNorm1 (batch stats) as one scale/shift FMA + ReLU ---------
    scale1, shift1 = bn_scale_shift(y1, gb1_ref[...])
    h1 = jnp.maximum(y1 * scale1 + shift1, 0.0)        # f32 epilogue (v5e-safe)

    # Write the H-haloed scratch: interior in one store, 2 zero halo rows/image.
    zrow = jnp.zeros((N, 1, CW1), jnp.float32)
    h1p_ref[:, 0:1, :] = zrow
    h1p_ref[:, H + 1:H + 2, :] = zrow
    h1p_ref[:, 1:H + 1, :] = h1.reshape(N, H, CW1)

    # -------- conv2: load slab once, K-stack the 3 kh taps, one matmul --------
    slab = h1p_ref[...]                                  # single slab load
    a2 = jnp.concatenate(
        [slab[:, kh:kh + H, :].reshape(M, CW1) for kh in range(3)],
        axis=-1).astype(jnp.bfloat16)                    # cast once, post-concat
    y2 = jnp.dot(a2, t2_ref[...], preferred_element_type=jnp.float32)

    # ---------------- BatchNorm2 + ReLU, single lane-dense store ----------------
    scale2, shift2 = bn_scale_shift(y2, gb2_ref[...])
    out_ref[...] = jnp.maximum(y2 * scale2 + shift2, 0.0)


def _toeplitz_conv_weights(w_oihw, W):
    """(Cout, Cin, 3, 3) -> (3*W*Cin, W*Cout) banded block-Toeplitz, kh-stacked on K.

    Block kh: T[w_in*Cin + ci, w_out*Cout + co] = w[co, ci, kh, kw] iff
    w_in == w_out + kw - 1, so kw shifts and width zero-padding live in the band."""
    Cout, Cin, KH, KW = w_oihw.shape
    mats = []
    for kh in range(KH):
        b = jnp.zeros((W * Cin, W * Cout), jnp.float32)
        for kw in range(KW):
            band = jnp.eye(W, k=1 - kw, dtype=jnp.float32)
            b = b + jnp.kron(band, jnp.transpose(w_oihw[:, :, kh, kw]))
        mats.append(b)
    return jnp.concatenate(mats, axis=0)


def _group_mean_matrix(W, C, count):
    """(W*C, W*C) matrix mapping packed per-(w,c) sums to per-channel means (tiled over w)."""
    return jnp.kron(jnp.ones((W, W), jnp.float32),
                    jnp.eye(C, dtype=jnp.float32)) / float(count)


def conv_block(x_nchw, params):
    """ConvBlock forward. x_nchw: (N, Cin, H, W) f32 -> (N, Cout, H, W) f32."""
    N, Cin, H, W = x_nchw.shape
    C1 = params['w1'].shape[0]
    C2 = params['w2'].shape[0]
    assert C1 == C2, "ConvBlock uses out_ch for both convs"

    # Lane-dense packing: NCHW -> NHWC -> H-pad -> (N, H+2, W*Cin); the three kh
    # taps are K-stacked in the wrapper (pure layout plumbing) and cast to bf16,
    # so conv1 needs no in-kernel slicing or casting at all.
    x_nhwc = jnp.transpose(x_nchw, (0, 2, 3, 1)).astype(jnp.float32)
    x_hpad = jnp.pad(x_nhwc, ((0, 0), (1, 1), (0, 0), (0, 0)))
    xw = x_hpad.reshape(N, H + 2, W * Cin)
    x1 = jnp.concatenate([xw[:, kh:kh + H, :] for kh in range(3)],
                         axis=-1).reshape(N * H, 3 * W * Cin).astype(jnp.bfloat16)

    # Banded block-Toeplitz conv weights, kh-stacked along K (bf16 MXU operands).
    # Conv biases are intentionally dropped: training-mode BatchNorm mean
    # subtraction cancels them exactly.
    T1s = _toeplitz_conv_weights(params['w1'], W).astype(jnp.bfloat16)  # (3*W*Cin, W*C1)
    T2s = _toeplitz_conv_weights(params['w2'], W).astype(jnp.bfloat16)  # (3*W*C1, W*C2)

    kmat = _group_mean_matrix(W, C1, N * H * W)                          # (W*C, W*C)

    gb1 = jnp.stack([jnp.tile(params['g1'], W),
                     jnp.tile(params['beta1'], W)]).astype(jnp.float32)  # (2, W*C1)
    gb2 = jnp.stack([jnp.tile(params['g2'], W),
                     jnp.tile(params['beta2'], W)]).astype(jnp.float32)  # (2, W*C2)

    vmem = pl.BlockSpec(memory_space=pltpu.MemorySpace.VMEM)
    out_packed = pl.pallas_call(
        convblock_kernel,
        out_shape=jax.ShapeDtypeStruct((N * H, W * C2), jnp.float32),
        in_specs=[vmem] * 6,
        out_specs=vmem,
        scratch_shapes=[pltpu.VMEM((N, H + 2, W * C1), jnp.float32)],
        compiler_params=pltpu.CompilerParams(vmem_limit_bytes=32 * 1024 * 1024),
    )(x1, T1s, T2s, kmat, gb1, gb2)

    out_nhwc = out_packed.reshape(N, H, W, C2)
    return jnp.transpose(out_nhwc, (0, 3, 1, 2))


def ref_conv_block(x_nchw, params):
    """Pure-JAX reference (training-mode BatchNorm) for correctness checking."""
    def conv(x, w, b):
        y = jax.lax.conv_general_dilated(
            x, w, window_strides=(1, 1), padding='SAME',
            dimension_numbers=('NCHW', 'OIHW', 'NCHW'))
        return y + b[None, :, None, None]

    def bn_relu(y, g, be):
        m = y.mean((0, 2, 3), keepdims=True)
        v = ((y - m) ** 2).mean((0, 2, 3), keepdims=True)
        return jnp.maximum((y - m) * jax.lax.rsqrt(v + EPS)
                           * g[None, :, None, None] + be[None, :, None, None], 0.0)

    h = bn_relu(conv(x_nchw, params['w1'], params['b1']), params['g1'], params['beta1'])
    return bn_relu(conv(h, params['w2'], params['b2']), params['g2'], params['beta2'])


def init_params(key, in_ch, out_ch):
    """Deterministic synthetic parameters in PyTorch-native shapes."""
    ks = jax.random.split(key, 8)
    return {
        'w1': 0.2 * jax.random.normal(ks[0], (out_ch, in_ch, 3, 3), jnp.float32),
        'b1': 0.1 * jax.random.normal(ks[1], (out_ch,), jnp.float32),
        'g1': 1.0 + 0.1 * jax.random.normal(ks[2], (out_ch,), jnp.float32),
        'beta1': 0.1 * jax.random.normal(ks[3], (out_ch,), jnp.float32),
        'w2': 0.2 * jax.random.normal(ks[4], (out_ch, out_ch, 3, 3), jnp.float32),
        'b2': 0.1 * jax.random.normal(ks[5], (out_ch,), jnp.float32),
        'g2': 1.0 + 0.1 * jax.random.normal(ks[6], (out_ch,), jnp.float32),
        'beta2': 0.1 * jax.random.normal(ks[7], (out_ch,), jnp.float32),
    }


if __name__ == "__main__":
    key = jax.random.PRNGKey(0)
    k_x, k_p = jax.random.split(key)

    N, IN_CH, OUT_CH, H, W = 2, 4, 8, 16, 16
    x = jax.random.normal(k_x, (N, IN_CH, H, W), jnp.float32)
    params = init_params(k_p, IN_CH, OUT_CH)

    out = jax.block_until_ready(jax.jit(conv_block)(x, params))
    ref = jax.block_until_ready(ref_conv_block(x, params))

    assert out.shape == (N, OUT_CH, H, W), out.shape
    # bf16 MXU operands introduce ~1e-2 deviations vs the f32 reference; loose tol is deliberate.
    np.testing.assert_allclose(np.asarray(out), np.asarray(ref), atol=5e-2, rtol=5e-2)
    print("KERNEL_OK")
</pallas_src>

<mosaic_0001>
module attributes {stable_mosaic.version = 11 : i64} {
  func.func @convblock_kernel(%arg0: memref<32x192xbf16, #tpu.memory_space<vmem>>, %arg1: memref<192x128xbf16, #tpu.memory_space<vmem>>, %arg2: memref<384x128xbf16, #tpu.memory_space<vmem>>, %arg3: memref<128x128xf32, #tpu.memory_space<vmem>>, %arg4: memref<2x128xf32, #tpu.memory_space<vmem>>, %arg5: memref<2x128xf32, #tpu.memory_space<vmem>>, %arg6: memref<32x128xf32, #tpu.memory_space<vmem>>, %arg7: memref<2x18x128xf32, #tpu.memory_space<vmem>>) attributes {dimension_semantics = [], scalar_prefetch = 0 : i64, scratch_operands = 1 : i64, tpu.core_type = #tpu.core_type<tc>} {
    %c0 = arith.constant 0 : index
    %c0_0 = arith.constant 0 : index
    %0 = vector.load %arg0[%c0, %c0_0] : memref<32x192xbf16, #tpu.memory_space<vmem>>, vector<32x192xbf16>
    %c0_1 = arith.constant 0 : index
    %c0_2 = arith.constant 0 : index
    %1 = vector.load %arg1[%c0_1, %c0_2] : memref<192x128xbf16, #tpu.memory_space<vmem>>, vector<192x128xbf16>
    %cst = arith.constant dense<0.000000e+00> : vector<32x128xf32>
    %2 = tpu.matmul %0, %1, %cst {dimension_numbers = #tpu.dot_dimension_numbers<[1], [0], [0], [1], [0, 0, 1, 1], [], []>} : vector<32x192xbf16>, vector<192x128xbf16>, vector<32x128xf32> -> vector<32x128xf32>
    %c0_3 = arith.constant 0 : index
    %c0_4 = arith.constant 0 : index
    %3 = vector.load %arg4[%c0_3, %c0_4] : memref<2x128xf32, #tpu.memory_space<vmem>>, vector<2x128xf32>
    %cst_5 = arith.constant dense<0.000000e+00> : vector<128xf32>
    %4 = vector.multi_reduction <add>, %2, %cst_5 [0] : vector<32x128xf32> to vector<128xf32>
    %5 = vector.shape_cast %4 : vector<128xf32> to vector<1x128xf32>
    %6 = arith.mulf %2, %2 : vector<32x128xf32>
    %cst_6 = arith.constant dense<0.000000e+00> : vector<128xf32>
    %7 = vector.multi_reduction <add>, %6, %cst_6 [0] : vector<32x128xf32> to vector<128xf32>
    %8 = vector.shape_cast %7 : vector<128xf32> to vector<1x128xf32>
    %9 = tpu.concatenate %5, %8 in 0 : vector<1x128xf32>, vector<1x128xf32> -> vector<2x128xf32>
    %c0_7 = arith.constant 0 : index
    %c0_8 = arith.constant 0 : index
    %10 = vector.load %arg3[%c0_7, %c0_8] : memref<128x128xf32, #tpu.memory_space<vmem>>, vector<128x128xf32>
    %cst_9 = arith.constant dense<0.000000e+00> : vector<2x128xf32>
    %11 = tpu.matmul %9, %10, %cst_9 {dimension_numbers = #tpu.dot_dimension_numbers<[1], [0], [0], [1], [0, 0, 1, 1], [], []>} : vector<2x128xf32>, vector<128x128xf32>, vector<2x128xf32> -> vector<2x128xf32>
    %12 = vector.extract_strided_slice %11 {offsets = [0, 0], sizes = [1, 128], strides = [1, 1]} : vector<2x128xf32> to vector<1x128xf32>
    %13 = vector.extract_strided_slice %11 {offsets = [1, 0], sizes = [1, 128], strides = [1, 1]} : vector<2x128xf32> to vector<1x128xf32>
    %14 = arith.mulf %12, %12 : vector<1x128xf32>
    %15 = arith.subf %13, %14 : vector<1x128xf32>
    %16 = vector.extract_strided_slice %3 {offsets = [0, 0], sizes = [1, 128], strides = [1, 1]} : vector<2x128xf32> to vector<1x128xf32>
    %cst_10 = arith.constant 9.99999974E-6 : f32
    %17 = vector.broadcast %cst_10 : f32 to vector<1x128xf32>
    %18 = arith.addf %15, %17 : vector<1x128xf32>
    %19 = math.rsqrt %18 : vector<1x128xf32>
    %20 = arith.mulf %16, %19 : vector<1x128xf32>
    %21 = vector.extract_strided_slice %3 {offsets = [1, 0], sizes = [1, 128], strides = [1, 1]} : vector<2x128xf32> to vector<1x128xf32>
    %22 = arith.mulf %12, %20 : vector<1x128xf32>
    %23 = arith.subf %21, %22 : vector<1x128xf32>
    %24 = vector.broadcast %20 : vector<1x128xf32> to vector<32x128xf32>
    %25 = arith.mulf %2, %24 : vector<32x128xf32>
    %26 = vector.broadcast %23 : vector<1x128xf32> to vector<32x128xf32>
    %27 = arith.addf %25, %26 : vector<32x128xf32>
    %cst_11 = arith.constant 0.000000e+00 : f32
    %28 = vector.broadcast %cst_11 : f32 to vector<32x128xf32>
    %29 = arith.maximumf %27, %28 : vector<32x128xf32>
    %cst_12 = arith.constant 0.000000e+00 : f32
    %30 = vector.broadcast %cst_12 : f32 to vector<2x1x128xf32>
    %c0_13 = arith.constant 0 : index
    %c0_14 = arith.constant 0 : index
    %c0_15 = arith.constant 0 : index
    %31 = vector.load %arg7[%c0_13, %c0_14, %c0_15] : memref<2x18x128xf32, #tpu.memory_space<vmem>>, vector<2x1x128xf32>
    tpu.vector_store %arg7[%c0_13, %c0_14, %c0_15], %30 {strides = array<i32>} : memref<2x18x128xf32, #tpu.memory_space<vmem>>, vector<2x1x128xf32>,
    %c0_16 = arith.constant 0 : index
    %c17 = arith.constant 17 : index
    %c0_17 = arith.constant 0 : index
    %32 = vector.load %arg7[%c0_16, %c17, %c0_17] : memref<2x18x128xf32, #tpu.memory_space<vmem>>, vector<2x1x128xf32>
    tpu.vector_store %arg7[%c0_16, %c17, %c0_17], %30 {strides = array<i32>} : memref<2x18x128xf32, #tpu.memory_space<vmem>>, vector<2x1x128xf32>,
    %33 = vector.shape_cast %29 : vector<32x128xf32> to vector<2x16x128xf32>
    %c0_18 = arith.constant 0 : index
    %c1 = arith.constant 1 : index
    %c0_19 = arith.constant 0 : index
    %34 = vector.load %arg7[%c0_18, %c1, %c0_19] : memref<2x18x128xf32, #tpu.memory_space<vmem>>, vector<2x16x128xf32>
    tpu.vector_store %arg7[%c0_18, %c1, %c0_19], %33 {strides = array<i32>} : memref<2x18x128xf32, #tpu.memory_space<vmem>>, vector<2x16x128xf32>,
    %c0_20 = arith.constant 0 : index
    %c0_21 = arith.constant 0 : index
    %c0_22 = arith.constant 0 : index
    %35 = vector.load %arg7[%c0_20, %c0_21, %c0_22] : memref<2x18x128xf32, #tpu.memory_space<vmem>>, vector<2x18x128xf32>
    %36 = vector.extract_strided_slice %35 {offsets = [0, 0, 0], sizes = [2, 16, 128], strides = [1, 1, 1]} : vector<2x18x128xf32> to vector<2x16x128xf32>
    %37 = vector.shape_cast %36 : vector<2x16x128xf32> to vector<32x128xf32>
    %38 = vector.extract_strided_slice %35 {offsets = [0, 1, 0], sizes = [2, 16, 128], strides = [1, 1, 1]} : vector<2x18x128xf32> to vector<2x16x128xf32>
    %39 = vector.shape_cast %38 : vector<2x16x128xf32> to vector<32x128xf32>
    %40 = vector.extract_strided_slice %35 {offsets = [0, 2, 0], sizes = [2, 16, 128], strides = [1, 1, 1]} : vector<2x18x128xf32> to vector<2x16x128xf32>
    %41 = vector.shape_cast %40 : vector<2x16x128xf32> to vector<32x128xf32>
    %42 = tpu.concatenate %37, %39, %41 in 1 : vector<32x128xf32>, vector<32x128xf32>, vector<32x128xf32> -> vector<32x384xf32>
    %43 = arith.truncf %42 : vector<32x384xf32> to vector<32x384xbf16>
    %c0_23 = arith.constant 0 : index
    %c0_24 = arith.constant 0 : index
    %44 = vector.load %arg2[%c0_23, %c0_24] : memref<384x128xbf16, #tpu.memory_space<vmem>>, vector<384x128xbf16>
    %cst_25 = arith.constant dense<0.000000e+00> : vector<32x128xf32>
    %45 = tpu.matmul %43, %44, %cst_25 {dimension_numbers = #tpu.dot_dimension_numbers<[1], [0], [0], [1], [0, 0, 1, 1], [], []>} : vector<32x384xbf16>, vector<384x128xbf16>, vector<32x128xf32> -> vector<32x128xf32>
    %c0_26 = arith.constant 0 : index
    %c0_27 = arith.constant 0 : index
    %46 = vector.load %arg5[%c0_26, %c0_27] : memref<2x128xf32, #tpu.memory_space<vmem>>, vector<2x128xf32>
    %cst_28 = arith.constant dense<0.000000e+00> : vector<128xf32>
    %47 = vector.multi_reduction <add>, %45, %cst_28 [0] : vector<32x128xf32> to vector<128xf32>
    %48 = vector.shape_cast %47 : vector<128xf32> to vector<1x128xf32>
    %49 = arith.mulf %45, %45 : vector<32x128xf32>
    %cst_29 = arith.constant dense<0.000000e+00> : vector<128xf32>
    %50 = vector.multi_reduction <add>, %49, %cst_29 [0] : vector<32x128xf32> to vector<128xf32>
    %51 = vector.shape_cast %50 : vector<128xf32> to vector<1x128xf32>
    %52 = tpu.concatenate %48, %51 in 0 : vector<1x128xf32>, vector<1x128xf32> -> vector<2x128xf32>
    %c0_30 = arith.constant 0 : index
    %c0_31 = arith.constant 0 : index
    %53 = vector.load %arg3[%c0_30, %c0_31] : memref<128x128xf32, #tpu.memory_space<vmem>>, vector<128x128xf32>
    %cst_32 = arith.constant dense<0.000000e+00> : vector<2x128xf32>
    %54 = tpu.matmul %52, %53, %cst_32 {dimension_numbers = #tpu.dot_dimension_numbers<[1], [0], [0], [1], [0, 0, 1, 1], [], []>} : vector<2x128xf32>, vector<128x128xf32>, vector<2x128xf32> -> vector<2x128xf32>
    %55 = vector.extract_strided_slice %54 {offsets = [0, 0], sizes = [1, 128], strides = [1, 1]} : vector<2x128xf32> to vector<1x128xf32>
    %56 = vector.extract_strided_slice %54 {offsets = [1, 0], sizes = [1, 128], strides = [1, 1]} : vector<2x128xf32> to vector<1x128xf32>
    %57 = arith.mulf %55, %55 : vector<1x128xf32>
    %58 = arith.subf %56, %57 : vector<1x128xf32>
    %59 = vector.extract_strided_slice %46 {offsets = [0, 0], sizes = [1, 128], strides = [1, 1]} : vector<2x128xf32> to vector<1x128xf32>
    %cst_33 = arith.constant 9.99999974E-6 : f32
    %60 = vector.broadcast %cst_33 : f32 to vector<1x128xf32>
    %61 = arith.addf %58, %60 : vector<1x128xf32>
    %62 = math.rsqrt %61 : vector<1x128xf32>
    %63 = arith.mulf %59, %62 : vector<1x128xf32>
    %64 = vector.extract_strided_slice %46 {offsets = [1, 0], sizes = [1, 128], strides = [1, 1]} : vector<2x128xf32> to vector<1x128xf32>
    %65 = arith.mulf %55, %63 : vector<1x128xf32>
    %66 = arith.subf %64, %65 : vector<1x128xf32>
    %67 = vector.broadcast %63 : vector<1x128xf32> to vector<32x128xf32>
    %68 = arith.mulf %45, %67 : vector<32x128xf32>
    %69 = vector.broadcast %66 : vector<1x128xf32> to vector<32x128xf32>
    %70 = arith.addf %68, %69 : vector<32x128xf32>
    %cst_34 = arith.constant 0.000000e+00 : f32
    %71 = vector.broadcast %cst_34 : f32 to vector<32x128xf32>
    %72 = arith.maximumf %70, %71 : vector<32x128xf32>
    %c0_35 = arith.constant 0 : index
    %c0_36 = arith.constant 0 : index
    %73 = vector.load %arg6[%c0_35, %c0_36] : memref<32x128xf32, #tpu.memory_space<vmem>>, vector<32x128xf32>
    tpu.vector_store %arg6[%c0_35, %c0_36], %72 {strides = array<i32>} : memref<32x128xf32, #tpu.memory_space<vmem>>, vector<32x128xf32>,
    return
  }
}

</mosaic_0001>

<bundles_post_ra>
// kernel: tile.23
= control target key start
LH: loop header
LB: loop body
LE: loop exit
PB: predicated region body
PF: predicated region fallthrough
CT: control target
= control target key end

     0   :  { %s28_s0 = inlined_call_operand.vmem [shape: f32[8], index: 0, kind: input, shape index: {}]   ;;  %s29_s1 = inlined_call_operand.vmem [shape: f32[16,8], index: 1, kind: output, shape index: {}]  }
   0x1   :  { %v4_v0 = vld [vmem:[%s28_s0] ss:$0 sm:$0xff] }
   0x2   :  { %5 = vst [vmem:[%s29_s1] sm:$0xff] %v4_v0  ;;  %8 = vst [vmem:[%s29_s1 + $0x8] sm:$0xff] %v4_v0 }

// kernel: tile.28
= control target key start
LH: loop header
LB: loop body
LE: loop exit
PB: predicated region body
PF: predicated region fallthrough
CT: control target
= control target key end

     0   :  { %s131_s10 = smov 120   ;;  %s132_s11 = smov 104   ;;  %vm3_vm0 = vcmask 64512   ;;  %vm9_vm1 = vcmask 1048512   ;;  %vm15_vm2 = vcmask 982912   ;;  %vm21_vm3 = vcmask 917312   ;;  %s207_s0 = inlined_call_operand.vmem [shape: f32[16,8], index: 0, kind: input, shape index: {}]   ;;  %s208_s1 = inlined_call_operand.vmem [shape: f32[1,128], index: 1, kind: output, shape index: {}]  }
   0x1   :  { %v101_v0 = vld [vmem:[%s207_s0 + $0xf] sm:$0x1]   ;;  %v103_v1 = vld [vmem:[%s207_s0 + $0xd] sm:$0x1]   ;;  %v102_v2 = vld [vmem:[%s207_s0 + $0xe] sm:$0x1]  }
   0x2   :  { %7 = vrot.lane.b32.xlu0 %v101_v0, %s131_s10  ;;  %19 = vrot.lane.b32.xlu1 %v103_v1, %s132_s11  ;;  %v104_v3 = vld [vmem:[%s207_s0 + $0xc] sm:$0x1]   ;;  %s133_s16 = smov 112   ;;  %s134_s17 = smov 96   ;;  %v105_v4 = vld [vmem:[%s207_s0 + $0xb] sm:$0x1]  }
   0x3   :  { %v106_v5 = vld [vmem:[%s207_s0 + $0xa] sm:$0x1]   ;;  %v2_v6 = vld [vmem:[%s207_s0] sm:$0x1]   ;;  %s135_s24 = smov 88   ;;  %s136_s25 = smov 80  }
   0x4   :  { %4 = vst.msk [vmem:[#allocation0] sm:$0x1] %vm3_vm0, %v2_v6   ;;  %v107_v7 = vld [vmem:[%s207_s0 + $0x9] sm:$0x1]   ;;  %v108_v8 = vld [vmem:[%s207_s0 + $0x8] sm:$0x1]  }
   0x5   :  { %s137_s30 = smov 72   ;;  %s138_s2 = smov 64   ;;  %v109_v9 = vld [vmem:[%s207_s0 + $0x7] sm:$0x1]   ;;  %v110_v10 = vld [vmem:[%s207_s0 + $0x6] sm:$0x1]  }
   0x6   :  { %13 = vrot.lane.b32.xlu0 %v102_v2, %s133_s16  ;;  %25 = vrot.lane.b32.xlu1 %v104_v3, %s134_s17  ;;  %s139_s7 = smov 56   ;;  %s140_s8 = smov 48   ;;  %v111_v11 = vld [vmem:[%s207_s0 + $0x5] sm:$0x1]   ;;  %v112_v12 = vld [vmem:[%s207_s0 + $0x4] sm:$0x1]  }
   0x7   :  { %s141_s13 = smov 40   ;;  %s142_s14 = smov 32   ;;  %v113_v13 = vld [vmem:[%s207_s0 + $0x3] sm:$0x1]   ;;  %v114_v14 = vld [vmem:[%s207_s0 + $0x2] sm:$0x1]  }
   0x8   :  { %s143_s19 = smov 24   ;;  %s144_s20 = smov 16   ;;  %v115_v15 = vld [vmem:[%s207_s0 + $0x1] sm:$0x1]   ;;  %vm27_vm4 = vcmask 851712   ;;  %vm33_vm5 = vcmask 786112  }
   0x9   :  { %s145_s0 = smov 8   ;;  %vm39_vm6 = vcmask 720512   ;;  %vm45_vm7 = vcmask 654912   ;;  %vm51_vm8 = vcmask 589312   ;;  %vm57_vm9 = vcmask 523712  }
   0xa   :  { %31 = vrot.lane.b32.xlu0 %v105_v4, %s135_s24  ;;  %37 = vrot.lane.b32.xlu1 %v106_v5, %s136_s25  ;;  %vm63_vm10 = vcmask 458112   ;;  %vm69_vm11 = vcmask 392512   ;;  %vm75_vm12 = vcmask 326912   ;;  %vm81_vm13 = vcmask 261312  }
   0xb   :  { %vm87_vm14 = vcmask 195712   ;;  %vm93_vm15 = vcmask 130112  }
   0xe   :  { %43 = vrot.lane.b32.xlu0 %v107_v7, %s137_s30  ;;  %49 = vrot.lane.b32.xlu1 %v108_v8, %s138_s2 }
  0x12   :  { %55 = vrot.lane.b32.xlu0 %v109_v9, %s139_s7  ;;  %61 = vrot.lane.b32.xlu1 %v110_v10, %s140_s8 }
  0x16   :  { %67 = vrot.lane.b32.xlu0 %v111_v11, %s141_s13  ;;  %73 = vrot.lane.b32.xlu1 %v112_v12, %s142_s14 }
  0x1a   :  { %79 = vrot.lane.b32.xlu0 %v113_v13, %s143_s19  ;;  %85 = vrot.lane.b32.xlu1 %v114_v14, %s144_s20 }
  0x1e   :  { %91 = vrot.lane.b32.xlu0 %v115_v15, %s145_s0 }
  0x74   :  { %v8_v16 = vpop.permute.xlu0 %7   ;;  %v20_v17 = vpop.permute.xlu1 %19  }
  0x75   :  { %10 = vst.msk [vmem:[#allocation0] sm:$0x1] %vm9_vm1, %v8_v16  }
  0x78   :  { %v14_v18 = vpop.permute.xlu0 %13   ;;  %v26_v19 = vpop.permute.xlu1 %25  }
  0x79   :  { %16 = vst.msk [vmem:[#allocation0] sm:$0x1] %vm15_vm2, %v14_v18  }
  0x7a   :  { %22 = vst.msk [vmem:[#allocation0] sm:$0x1] %vm21_vm3, %v20_v17  }
  0x7b   :  { %28 = vst.msk [vmem:[#allocation0] sm:$0x1] %vm27_vm4, %v26_v19  }
  0x7c   :  { %v32_v20 = vpop.permute.xlu0 %31   ;;  %v38_v21 = vpop.permute.xlu1 %37  }
  0x7d   :  { %34 = vst.msk [vmem:[#allocation0] sm:$0x1] %vm33_vm5, %v32_v20  }
  0x7e   :  { %40 = vst.msk [vmem:[#allocation0] sm:$0x1] %vm39_vm6, %v38_v21  }
  0x80   :  { %v44_v22 = vpop.permute.xlu0 %43   ;;  %v50_v23 = vpop.permute.xlu1 %49  }
  0x81   :  { %46 = vst.msk [vmem:[#allocation0] sm:$0x1] %vm45_vm7, %v44_v22  }
  0x82   :  { %52 = vst.msk [vmem:[#allocation0] sm:$0x1] %vm51_vm8, %v50_v23  }
  0x84   :  { %v56_v24 = vpop.permute.xlu0 %55   ;;  %v62_v25 = vpop.permute.xlu1 %61  }
  0x85   :  { %58 = vst.msk [vmem:[#allocation0] sm:$0x1] %vm57_vm9, %v56_v24  }
  0x86   :  { %64 = vst.msk [vmem:[#allocation0] sm:$0x1] %vm63_vm10, %v62_v25  }
  0x88   :  { %v68_v26 = vpop.permute.xlu0 %67   ;;  %v74_v27 = vpop.permute.xlu1 %73  }
  0x89   :  { %70 = vst.msk [vmem:[#allocation0] sm:$0x1] %vm69_vm11, %v68_v26  }
  0x8a   :  { %76 = vst.msk [vmem:[#allocation0] sm:$0x1] %vm75_vm12, %v74_v27  }
  0x8c   :  { %v80_v28 = vpop.permute.xlu0 %79   ;;  %v86_v29 = vpop.permute.xlu1 %85  }
  0x8d   :  { %82 = vst.msk [vmem:[#allocation0] sm:$0x1] %vm81_vm13, %v80_v28  }
  0x8e   :  { %88 = vst.msk [vmem:[#allocation0] sm:$0x1] %vm87_vm14, %v86_v29  }
  0x90   :  { %v92_v30 = vpop.permute.xlu0 %91  }
  0x91   :  { %94 = vst.msk [vmem:[#allocation0] sm:$0x1] %vm93_vm15, %v92_v30  }
  0x98   :  { %v98_v31 = vld [vmem:[#allocation0] sm:$0x1] }
  0x99   :  { %100 = vst [vmem:[%s208_s1] sm:$0x1] %v98_v31 }

// kernel: conv_block.1
= control target key start
LH: loop header
LB: loop body
LE: loop exit
PB: predicated region body
PF: predicated region fallthrough
CT: control target
= control target key end

     0   :  { %v1147_v0 = vmov 0   ;;  %v1148_v2 = vmov 0.0|0.0   ;;  %vm142_vm0 = vcmask 523264   ;;  %vm1149_vm1 = vmmov 0   ;;  %s1476_s1 = inlined_call_operand.vmem [shape: bf16[192,128], index: 1, kind: input, shape index: {}]   ;;  %s1477_s0 = inlined_call_operand.vmem [shape: bf16[32,192], index: 0, kind: input, shape index: {}]   ;;  %s1478_s3 = inlined_call_operand.vmem [shape: f32[128,128], index: 3, kind: input, shape index: {}]   ;;  %s1479_s2 = inlined_call_operand.vmem [shape: bf16[384,128], index: 2, kind: input, shape index: {}]   ;;  %s1480_s4 = inlined_call_operand.vmem [shape: f32[2,128], index: 4, kind: input, shape index: {}]   ;;  %s1481_s5 = inlined_call_operand.vmem [shape: f32[2,128], index: 5, kind: input, shape index: {}]   ;;  %s1482_s6 = inlined_call_operand.vmem [shape: f32[32,128], index: 6, kind: output, shape index: {}]  }
   0x1   :  { %149 = vmatprep.subr.bf16.mxu0 %v1147_v0  ;;  %v1101_v1 = vld [vmem:[%s1476_s1] sm:$0xff]   ;;  %1049 = vmatprep.subr.bf16.mxu1 %v1148_v2  ;;  %v1102_v3 = vld [vmem:[%s1476_s1 + $0x8] sm:$0xff]   ;;  %v1103_v4 = vld [vmem:[%s1476_s1 + $0x10] sm:$0xff]   ;;  %v1150_v41 = vmov 0.0   ;;  %vm221_vm2 = vcmask 1040384   ;;  %vm365_vm3 = vcmask 1046528  }
   0x2   :  { %150 = vmatpush1.bf16.msra.mxu0 %v1101_v1  ;;  %v1104_v5 = vld [vmem:[%s1476_s1 + $0x18] sm:$0xff]   ;;  %v1115_v6 = vld [vmem:[%s1477_s0 + $0x4] ss:$8 sps:$4 sm:$0xff]   ;;  %v1107_v12 = vld [vmem:[%s1476_s1 + $0x30] sm:$0xff]   ;;  %991 = vmatprep.mubr.msk.f32.mxu1 %vm1149_vm1, %v1150_v41  ;;  %345 = vst [vmem:[#allocation2] sm:$0x1] %v1150_v41 }
   0x3   :  { %151 = vmatprep.subr.bf16.mxu0 %v1147_v0  ;;  %v1105_v7 = vld [vmem:[%s1476_s1 + $0x20] sm:$0xff]   ;;  %861 = vmatprep.mubr.msk.bf16.mxu0 %vm142_vm0, %v1115_v6  ;;  %v224_v9 = vld [vmem:[%s1478_s3 + $0x8] sm:$0xff]  ;;  %v1108_v13 = vld [vmem:[%s1476_s1 + $0x38] sm:$0xff]   ;;  %346 = vst [vmem:[#allocation2 + $0x18] sm:$0x1] %v1150_v41  ;;  %vm380_vm4 = vcmask 1045504  }
   0x4   :  { %v223_v8 = vld [vmem:[%s1478_s3] sm:$0xff]  ;;  %v1106_v11 = vld [vmem:[%s1476_s1 + $0x28] sm:$0xff]   ;;  %v1111_v16 = vld [vmem:[%s1476_s1 + $0x50] sm:$0xff]   ;;  %347 = vst [vmem:[#allocation2 + $0x11] sm:$0x1] %v1150_v41 }
   0x5   :  { %v1212_v10 = vpack.c.bf16 %v224_v9, %v223_v8  ;;  %v1109_v14 = vld [vmem:[%s1476_s1 + $0x40] sm:$0xff]   ;;  %v1110_v15 = vld [vmem:[%s1476_s1 + $0x48] sm:$0xff]   ;;  %v1112_v17 = vld [vmem:[%s1476_s1 + $0x58] sm:$0xff]   ;;  %348 = vst [vmem:[#allocation2 + $0x29] sm:$0x1] %v1150_v41 }
   0x6   :  { %152 = vmatpush1.bf16.msra.mxu0 %v1102_v3  ;;  %v1113_v18 = vld [vmem:[%s1477_s0] ss:$8 sps:$4 sm:$0xff]   ;;  %v1116_v19 = vld [vmem:[%s1477_s0 + $0x14] ss:$8 sps:$4 sm:$0xff]   ;;  %v1118_v20 = vld [vmem:[%s1477_s0 + $0x10] ss:$8 sps:$4 sm:$0xff]  }
   0x7   :  { %153 = vmatprep.subr.bf16.mxu0 %v1147_v0  ;;  %1051 = vmatpush3.bf16.msra.mxu1 %v1212_v10  ;;  %v225_v21 = vld [vmem:[%s1478_s3 + $0x10] sm:$0xff]  ;;  %v226_v22 = vld [vmem:[%s1478_s3 + $0x18] sm:$0xff]  ;;  %v227_v24 = vld [vmem:[%s1478_s3 + $0x20] sm:$0xff] }
   0x8   :  { %1052 = vmatprep.subr.bf16.mxu1 %v1148_v2  ;;  %v1253_v23 = vpack.c.bf16 %v226_v22, %v225_v21  ;;  %v228_v25 = vld [vmem:[%s1478_s3 + $0x28] sm:$0xff]  ;;  %v229_v27 = vld [vmem:[%s1478_s3 + $0x30] sm:$0xff]  ;;  %v230_v28 = vld [vmem:[%s1478_s3 + $0x38] sm:$0xff] }
   0x9   :  { %v1263_v26 = vpack.c.bf16 %v228_v25, %v227_v24  ;;  %v1273_v29 = vpack.c.bf16 %v230_v28, %v229_v27  ;;  %v231_v30 = vld [vmem:[%s1478_s3 + $0x40] sm:$0xff]  ;;  %v232_v31 = vld [vmem:[%s1478_s3 + $0x48] sm:$0xff]  ;;  %v233_v33 = vld [vmem:[%s1478_s3 + $0x50] sm:$0xff] }
   0xa   :  { %154 = vmatpush1.bf16.msra.mxu0 %v1103_v4  ;;  %v1283_v32 = vpack.c.bf16 %v232_v31, %v231_v30  ;;  %v234_v34 = vld [vmem:[%s1478_s3 + $0x58] sm:$0xff]  ;;  %v235_v36 = vld [vmem:[%s1478_s3 + $0x60] sm:$0xff]  ;;  %v236_v37 = vld [vmem:[%s1478_s3 + $0x68] sm:$0xff] }
   0xb   :  { %155 = vmatprep.subr.bf16.mxu0 %v1147_v0  ;;  %1054 = vmatpush3.bf16.msra.mxu1 %v1253_v23  ;;  %v1293_v35 = vpack.c.bf16 %v234_v34, %v233_v33  ;;  %v1303_v38 = vpack.c.bf16 %v236_v37, %v235_v36  ;;  %v237_v39 = vld [vmem:[%s1478_s3 + $0x70] sm:$0xff]  ;;  %v238_v40 = vld [vmem:[%s1478_s3 + $0x78] sm:$0xff]  ;;  %v1131_v25 = vld [vmem:[%s1479_s2 + $0x60] sm:$0xff]  }
   0xc   :  { %1055 = vmatprep.subr.bf16.mxu1 %v1148_v2  ;;  %v1318_v42 = vpack.c.bf16 %v238_v40, %v237_v39  ;;  %v1128_v21 = vld [vmem:[%s1479_s2 + $0x58] sm:$0xff]   ;;  %v1132_v27 = vld [vmem:[%s1479_s2 + $0xa0] sm:$0xff]   ;;  %v1134_v30 = vld [vmem:[%s1479_s2 + $0x68] sm:$0xff]  }
   0xd   :  { %v1129_v22 = vld [vmem:[%s1479_s2 + $0x98] sm:$0xff]   ;;  %v1133_v28 = vld [vmem:[%s1479_s2 + $0x20] sm:$0xff]   ;;  %v1135_v31 = vld [vmem:[%s1479_s2 + $0xa8] sm:$0xff]  }
   0xe   :  { %156 = vmatpush1.bf16.msra.mxu0 %v1104_v5  ;;  %v1130_v24 = vld [vmem:[%s1479_s2 + $0x18] sm:$0xff]   ;;  %v1136_v33 = vld [vmem:[%s1479_s2 + $0x28] sm:$0xff]   ;;  %v1137_v34 = vld [vmem:[%s1479_s2 + $0x70] sm:$0xff]  }
   0xf   :  { %157 = vmatprep.subr.bf16.mxu0 %v1147_v0  ;;  %1057 = vmatpush3.bf16.msra.mxu1 %v1263_v26  ;;  %v1138_v36 = vld [vmem:[%s1479_s2 + $0xb0] sm:$0xff]   ;;  %v1140_v39 = vld [vmem:[%s1479_s2 + $0x78] sm:$0xff]  }
  0x10   :  { %1058 = vmatprep.subr.bf16.mxu1 %v1148_v2  ;;  %v1139_v37 = vld [vmem:[%s1479_s2 + $0x30] sm:$0xff]   ;;  %v1141_v40 = vld [vmem:[%s1479_s2 + $0xb8] sm:$0xff]  }
  0x12   :  { %158 = vmatpush1.bf16.msra.mxu0 %v1105_v7 }
  0x13   :  { %159 = vmatprep.subr.bf16.mxu0 %v1147_v0  ;;  %1060 = vmatpush3.bf16.msra.mxu1 %v1273_v29 }
  0x14   :  { %1061 = vmatprep.subr.bf16.mxu1 %v1148_v2 }
  0x16   :  { %160 = vmatpush1.bf16.msra.mxu0 %v1106_v11 }
  0x17   :  { %161 = vmatprep.subr.bf16.mxu0 %v1147_v0  ;;  %1063 = vmatpush3.bf16.msra.mxu1 %v1283_v32 }
  0x18   :  { %1064 = vmatprep.subr.bf16.mxu1 %v1148_v2 }
  0x1a   :  { %162 = vmatpush1.bf16.msra.mxu0 %v1107_v12  ;;  %v1119_v12 = vld [vmem:[%s1479_s2 + $0x40] sm:$0xff]  }
  0x1b   :  { %163 = vmatprep.subr.bf16.mxu0 %v1147_v0  ;;  %1066 = vmatpush3.bf16.msra.mxu1 %v1293_v35 }
  0x1c   :  { %1067 = vmatprep.subr.bf16.mxu1 %v1148_v2 }
  0x1e   :  { %164 = vmatpush1.bf16.msra.mxu0 %v1108_v13  ;;  %v1120_v13 = vld [vmem:[%s1479_s2 + $0x80] sm:$0xff]  }
  0x1f   :  { %165 = vmatprep.subr.bf16.mxu0 %v1147_v0  ;;  %1069 = vmatpush3.bf16.msra.mxu1 %v1303_v38 }
  0x20   :  { %1070 = vmatprep.subr.bf16.mxu1 %v1148_v2 }
  0x22   :  { %166 = vmatpush1.bf16.msra.mxu0 %v1109_v14  ;;  %v1121_v14 = vld [vmem:[%s1479_s2] sm:$0xff]  }
  0x23   :  { %167 = vmatprep.subr.bf16.mxu0 %v1147_v0  ;;  %1072 = vmatpush3.bf16.msra.mxu1 %v1318_v42 }
  0x24   :  { %904 = vmatprep.subr.bf16.mxu1 %v1119_v12 }
  0x26   :  { %168 = vmatpush1.bf16.msra.mxu0 %v1110_v15  ;;  %v1122_v15 = vld [vmem:[%s1479_s2 + $0x48] sm:$0xff]  }
  0x27   :  { %169 = vmatprep.subr.bf16.mxu0 %v1147_v0 }
  0x2a   :  { %170 = vmatpush1.bf16.msra.mxu0 %v1111_v16  ;;  %v1123_v16 = vld [vmem:[%s1479_s2 + $0x88] sm:$0xff]  }
  0x2b   :  { %171 = vmatprep.subr.bf16.mxu0 %v1147_v0 }
  0x2e   :  { %172 = vmatpush1.bf16.msra.mxu0 %v1112_v17  ;;  %v1124_v17 = vld [vmem:[%s1479_s2 + $0x8] sm:$0xff]  }
  0x2f   :  { %994 = vmatprep.subr.bf16.mxu0 %v1120_v13 }
  0x31   :  { %182 = vmatmul.mubr.bf16.vlgmr.msra.gmra.mrb[0].mxu0 %v1113_v18  ;;  %v1125_v18 = vld [vmem:[%s1479_s2 + $0x50] sm:$0xff]  }
  0x32   :  { %862 = vmatprep.mubr.msk.bf16.mxu0 %vm142_vm0, %v1116_v19  ;;  %995 = vmatpush3.bf16.msra.mxu0 %v1120_v13  ;;  %v1126_v19 = vld [vmem:[%s1479_s2 + $0x90] sm:$0xff]  }
  0x33   :  { %996 = vmatprep.subr.bf16.mxu0 %v1123_v16 }
  0x36   :  { %997 = vmatpush3.bf16.msra.mxu0 %v1123_v16 }
  0x37   :  { %998 = vmatprep.subr.bf16.mxu0 %v1126_v19 }
  0x39   :  { %190 = vmatmul.mubr.bf16.gmra.mrb[4].mxu0 %v1118_v20  ;;  %v1127_v20 = vld [vmem:[%s1479_s2 + $0x10] sm:$0xff]  }
  0x3a   :  { %999 = vmatpush3.bf16.msra.mxu0 %v1126_v19 }
  0x3b   :  { %1000 = vmatprep.subr.bf16.mxu0 %v1129_v22 }
  0x3e   :  { %1001 = vmatpush3.bf16.msra.mxu0 %v1129_v22 }
  0x3f   :  { %1002 = vmatprep.subr.bf16.mxu0 %v1132_v27 }
  0x42   :  { %1003 = vmatpush3.bf16.msra.mxu0 %v1132_v27 }
  0x43   :  { %1004 = vmatprep.subr.bf16.mxu0 %v1135_v31 }
  0x46   :  { %1005 = vmatpush3.bf16.msra.mxu0 %v1135_v31 }
  0x47   :  { %1006 = vmatprep.subr.bf16.mxu0 %v1138_v36 }
  0x4a   :  { %1007 = vmatpush3.bf16.msra.mxu0 %v1138_v36 }
  0x4b   :  { %1008 = vmatprep.subr.bf16.mxu0 %v1141_v40 }
  0x4e   :  { %1009 = vmatpush3.bf16.msra.mxu0 %v1141_v40 }
 0x104   :  { %v1322_v43 = vpop.f32.mrb[0].mxu0 }
 0x105   :  { %v185_v44 = vpop.f32.mrb[1].mxu0  ;;  %v208_v46 = vmul.f32 %v1322_v43, %v1322_v43 }
 0x106   :  { %v1324_v45 = vpop.f32.mrb[2].mxu0  ;;  %v1142_v44 = vld [vmem:[%s1479_s2 + $0x38] sm:$0xff]  }
 0x107   :  { %v199_v47 = vadd.f32 %v1324_v45, %v1322_v43  ;;  %v209_v48 = vmul.f32 %v1324_v45, %v1324_v45  ;;  %v188_v49 = vpop.f32.mrb[3].mxu0 }
 0x109   :  { %v212_v50 = vadd.f32 %v209_v48, %v208_v46 }
 0x10c   :  { %v1332_v51 = vpop.f32.mrb[4].mxu0 }
 0x10d   :  { %v200_v52 = vadd.f32 %v199_v47, %v1332_v51  ;;  %v210_v53 = vmul.f32 %v1332_v51, %v1332_v51  ;;  %v193_v54 = vpop.f32.mrb[5].mxu0 }
 0x10e   :  { %v1337_v55 = vpop.f32.mrb[6].mxu0 }
 0x10f   :  { %v213_v56 = vadd.f32 %v212_v50, %v210_v53  ;;  %v201_v57 = vadd.f32 %v200_v52, %v1337_v55  ;;  %v211_v58 = vmul.f32 %v1337_v55, %v1337_v55  ;;  %v196_v59 = vpop.f32.mrb[7].mxu0  ;;  %v325_v53 = vlaneseq }
 0x111   :  { %v202_v60 = vrot.slane %v201_v57, 4  ;;  %v214_v61 = vadd.f32 %v213_v56, %v211_v58  ;;  %v1416_v54 = vshrl.u32 %v325_v53, 7 }
 0x113   :  { %v203_v62 = vadd.f32 %v202_v60, %v201_v57  ;;  %v215_v63 = vrot.slane %v214_v61, 4  ;;  %v198_v57 = vld [vmem:[%s1480_s4] sm:$0x3]  ;;  %v327_v59 = vsub.s32 0, %v1416_v54 }
 0x115   :  { %v204_v0 = vrot.slane %v203_v62, 2  ;;  %v216_v1 = vadd.f32 %v215_v63, %v214_v61  ;;  %v335_v63 = vsub.s32 1, %v1416_v54 }
 0x117   :  { %v205_v3 = vadd.f32 %v204_v0, %v203_v62  ;;  %v217_v4 = vrot.slane %v216_v1, 2 }
 0x119   :  { %v206_v5 = vrot.slane %v205_v3, 1  ;;  %v218_v6 = vadd.f32 %v217_v4, %v216_v1 }
 0x11b   :  { %v219_v7 = vrot.slane %v218_v6, 1  ;;  %v207_v8 = vadd.f32 %v206_v5, %v205_v3 }
 0x11d   :  { %v220_v9 = vadd.f32 %v219_v7, %v218_v6 }
 0x11f   :  { %v222_v11 = vsel %vm221_vm2, %v207_v8, %v220_v9 }
 0x120   :  { %992 = vmatmul.mubr.f32.vlgmr.msra.gmra.mrb[0].mxu1 %v222_v11 }
 0x121   :  { %905 = vmatpush3.bf16.msra.mxu1 %v1121_v14 }
 0x122   :  { %906 = vmatprep.subr.bf16.mxu1 %v1122_v15 }
 0x125   :  { %907 = vmatpush3.bf16.msra.mxu1 %v1124_v17 }
 0x126   :  { %908 = vmatprep.subr.bf16.mxu1 %v1125_v18 }
 0x129   :  { %909 = vmatpush3.bf16.msra.mxu1 %v1127_v20 }
 0x12a   :  { %910 = vmatprep.subr.bf16.mxu1 %v1128_v21 }
 0x12d   :  { %911 = vmatpush3.bf16.msra.mxu1 %v1130_v24 }
 0x12e   :  { %912 = vmatprep.subr.bf16.mxu1 %v1131_v25 }
 0x131   :  { %913 = vmatpush3.bf16.msra.mxu1 %v1133_v28 }
 0x132   :  { %914 = vmatprep.subr.bf16.mxu1 %v1134_v30 }
 0x135   :  { %915 = vmatpush3.bf16.msra.mxu1 %v1136_v33 }
 0x136   :  { %916 = vmatprep.subr.bf16.mxu1 %v1137_v34 }
 0x139   :  { %917 = vmatpush3.bf16.msra.mxu1 %v1139_v37 }
 0x13a   :  { %918 = vmatprep.subr.bf16.mxu1 %v1140_v39 }
 0x13d   :  { %919 = vmatpush3.bf16.msra.mxu1 %v1142_v44 }
 0x13e   :  { %1073 = vmatprep.subr.bf16.mxu1 %v1148_v2 }
 0x1f3   :  { %v305_v46 = vpop.f32.mrb[0].mxu1 }
 0x1f4   :  { %v309_v47 = vmul.f32 %v305_v46, %v305_v46  ;;  %v993_v48 = vpop.f32.mrb[1].mxu1 }
 0x1f6   :  { %v311_v49 = vrot.slane %v309_v47, 7 }
 0x1f8   :  { %v313_v50 = vsub.f32 %v305_v46, %v311_v49 }
 0x1fa   :  { %v314_v52 = vadd.f32 1e-05, %v313_v50 }
 0x1fc   :  { %1143 = vrsqrt.f32 %v314_v52 }
 0x206   :  { %v1144_v56 = vpop.eup %1143 }
 0x207   :  { %v317_v58 = vrot.slane %v1144_v56, 1 }
 0x209   :  { %v319_v60 = vmul.f32 %v317_v58, %v198_v57 }
 0x20b   :  { %v320_v61 = vmul.f32 %v319_v60, %v305_v46  ;;  %v328_v62 = vrot.slane %v319_v60, %v327_v59 }
 0x20d   :  { %v322_v0 = vrot.slane %v320_v61, 7  ;;  %v329_v1 = vmul.f32 %v328_v62, %v1322_v43  ;;  %v330_v3 = vmul.f32 %v328_v62, %v1324_v45  ;;  %v331_v4 = vmul.f32 %v328_v62, %v1332_v51 }
 0x20e   :  { %v332_v5 = vmul.f32 %v328_v62, %v1337_v55 }
 0x20f   :  { %v324_v6 = vsub.f32 %v198_v57, %v322_v0 }
 0x211   :  { %v336_v7 = vrot.slane %v324_v6, %v335_v63 }
 0x213   :  { %v337_v8 = vadd.f32 %v336_v7, %v329_v1  ;;  %v338_v9 = vadd.f32 %v336_v7, %v330_v3  ;;  %v339_v11 = vadd.f32 %v336_v7, %v331_v4  ;;  %v340_v12 = vadd.f32 %v336_v7, %v332_v5 }
 0x215   :  { %v341_v13 = vmax.f32 %v337_v8, 0.0  ;;  %v342_v14 = vmax.f32 %v338_v9, 0.0  ;;  %v343_v15 = vmax.f32 %v339_v11, 0.0  ;;  %v344_v16 = vmax.f32 %v340_v12, 0.0 }
 0x217   :  { %349 = vst [vmem:[#allocation2 + $0x1] sm:$0xff] %v341_v13  ;;  %350 = vst [vmem:[#allocation2 + $0x9] sm:$0xff] %v342_v14 }
 0x218   :  { %351 = vst [vmem:[#allocation2 + $0x19] sm:$0xff] %v343_v15  ;;  %352 = vst [vmem:[#allocation2 + $0x21] sm:$0xff] %v344_v16 }
 0x21e   :  { %v353_v43 = vld [vmem:[#allocation2] sm:$0xff]  ;;  %v354_v45 = vld [vmem:[#allocation2 + $0x8] sm:$0xff]  ;;  %v355_v51 = vld [vmem:[#allocation2 + $0x10] sm:$0x3] }
 0x21f   :  { %v366_v55 = vrot.slane %v353_v43, 1  ;;  %v367_v17 = vrot.slane %v354_v45, 1  ;;  %v369_v18 = vrot.slane %v355_v51, 1  ;;  %v381_v19 = vrot.slane %v353_v43, 2  ;;  %v356_v20 = vld [vmem:[#allocation2 + $0x18] sm:$0xff]  ;;  %v357_v21 = vld [vmem:[#allocation2 + $0x20] sm:$0xff] }
 0x220   :  { %v382_v22 = vrot.slane %v354_v45, 2  ;;  %v384_v24 = vrot.slane %v355_v51, 2  ;;  %v395_v25 = vpack.c.bf16 %v354_v45, %v353_v43  ;;  %v358_v27 = vld [vmem:[#allocation2 + $0x28] sm:$0x3]  ;;  %v386_v28 = vrot.slane %v356_v20, 2 }
 0x221   :  { %v368_v30 = vsel %vm365_vm3, %v366_v55, %v367_v17  ;;  %v370_v31 = vsel %vm365_vm3, %v367_v17, %v369_v18  ;;  %v387_v33 = vrot.slane %v357_v21, 2  ;;  %v389_v34 = vrot.slane %v358_v27, 2 }
 0x222   :  { %v396_v36 = vpack.c.bf16 %v370_v31, %v368_v30  ;;  %v383_v37 = vsel %vm380_vm4, %v381_v19, %v382_v22  ;;  %v385_v39 = vsel %vm380_vm4, %v382_v22, %v384_v24  ;;  %v371_v40 = vrot.slane %v356_v20, 1 }
 0x223   :  { %v397_v44 = vpack.c.bf16 %v385_v39, %v383_v37  ;;  %v388_v46 = vsel %vm380_vm4, %v386_v28, %v387_v33  ;;  %v390_v47 = vsel %vm380_vm4, %v387_v33, %v389_v34  ;;  %v372_v48 = vrot.slane %v357_v21, 1 }
 0x224   :  { %625 = vmatprep.mubr.bf16.mxu1 %v396_v36  ;;  %v400_v49 = vpack.c.bf16 %v390_v47, %v388_v46  ;;  %v374_v50 = vrot.slane %v358_v27, 1  ;;  %v398_v57 = vpack.c.bf16 %v357_v21, %v356_v20 }
 0x225   :  { %1010 = vmatprep.mubr.bf16.mxu0 %v397_v44  ;;  %626 = vmatmul.mubr.bf16.vlgmr.msra.gmra.mrb[4].mxu1 %v395_v25  ;;  %v373_v52 = vsel %vm365_vm3, %v371_v40, %v372_v48  ;;  %v691_v40 = vld [vmem:[%s1481_s5] sm:$0x3] }
 0x226   :  { %1011 = vmatmul.mubr.bf16.vlgmr.msra.gmra.mrb[8].mxu0 %v400_v49  ;;  %v375_v53 = vsel %vm365_vm3, %v372_v48, %v374_v50  ;;  %1075 = vmatpush3.bf16.msra.mxu1 %v1212_v10 }
 0x227   :  { %v399_v56 = vpack.c.bf16 %v375_v53, %v373_v52  ;;  %1076 = vmatprep.subr.bf16.mxu1 %v1148_v2 }
 0x229   :  { %633 = vmatprep.mubr.bf16.mxu1 %v399_v56 }
 0x22a   :  { %1078 = vmatpush3.bf16.msra.mxu1 %v1253_v23 }
 0x22b   :  { %1079 = vmatprep.subr.bf16.mxu1 %v1148_v2 }
 0x22d   :  { %634 = vmatmul.mubr.bf16.gmra.mrb[8].mxu1 %v398_v57 }
 0x22e   :  { %1081 = vmatpush3.bf16.msra.mxu1 %v1263_v26  ;;  %1046 = vmatprep.mubr.msk.f32.mxu1 %vm1149_vm1, %v1150_v41 }
 0x22f   :  { %1082 = vmatprep.subr.bf16.mxu1 %v1148_v2 }
 0x232   :  { %1084 = vmatpush3.bf16.msra.mxu1 %v1273_v29 }
 0x233   :  { %1085 = vmatprep.subr.bf16.mxu1 %v1148_v2 }
 0x236   :  { %1087 = vmatpush3.bf16.msra.mxu1 %v1283_v32 }
 0x237   :  { %1088 = vmatprep.subr.bf16.mxu1 %v1148_v2 }
 0x23a   :  { %1090 = vmatpush3.bf16.msra.mxu1 %v1293_v35 }
 0x23b   :  { %1091 = vmatprep.subr.bf16.mxu1 %v1148_v2 }
 0x23e   :  { %1093 = vmatpush3.bf16.msra.mxu1 %v1303_v38 }
 0x23f   :  { %1094 = vmatprep.subr.bf16.mxu1 %v1148_v2 }
 0x242   :  { %1096 = vmatpush3.bf16.msra.mxu1 %v1318_v42 }
 0x2f8   :  { %v920_v10 = vpop.f32.mrb[4].mxu1 }
 0x2f9   :  { %v1012_v23 = vpop.f32.mrb[8].mxu0  ;;  %v921_v26 = vpop.f32.mrb[5].mxu1 }
 0x2fa   :  { %v922_v29 = vadd.f32 %v921_v26, %v920_v10  ;;  %v676_v41 = vpop.f32.mrb[9].mxu0  ;;  %v923_v58 = vpop.f32.mrb[6].mxu1 }
 0x2fb   :  { %v1013_v60 = vpop.f32.mrb[10].mxu0  ;;  %v924_v32 = vpop.f32.mrb[7].mxu1 }
 0x2fc   :  { %v677_v61 = vadd.f32 %v922_v29, %v676_v41  ;;  %v925_v62 = vadd.f32 %v924_v32, %v923_v58  ;;  %v679_v0 = vpop.f32.mrb[11].mxu0 }
 0x2fe   :  { %v680_v35 = vadd.f32 %v925_v62, %v679_v0  ;;  %v701_v6 = vmul.f32 %v677_v61, %v677_v61 }
 0x300   :  { %v926_v1 = vpop.f32.mrb[8].mxu1  ;;  %v702_v4 = vmul.f32 %v680_v35, %v680_v35  ;;  %v692_v42 = vadd.f32 %v680_v35, %v677_v61 }
 0x301   :  { %v927_v3 = vpop.f32.mrb[9].mxu1 }
 0x302   :  { %v928_v38 = vadd.f32 %v927_v3, %v926_v1  ;;  %v929_v5 = vpop.f32.mrb[10].mxu1  ;;  %v705_v9 = vadd.f32 %v702_v4, %v701_v6 }
 0x303   :  { %v930_v2 = vpop.f32.mrb[11].mxu1 }
 0x304   :  { %v685_v7 = vadd.f32 %v1012_v23, %v928_v38  ;;  %v931_v8 = vadd.f32 %v930_v2, %v929_v5 }
 0x306   :  { %v693_v11 = vadd.f32 %v692_v42, %v685_v7  ;;  %v703_v12 = vmul.f32 %v685_v7, %v685_v7  ;;  %v688_v13 = vadd.f32 %v1013_v60, %v931_v8 }
 0x308   :  { %v706_v14 = vadd.f32 %v705_v9, %v703_v12  ;;  %v694_v15 = vadd.f32 %v693_v11, %v688_v13  ;;  %v704_v16 = vmul.f32 %v688_v13, %v688_v13 }
 0x30a   :  { %v695_v43 = vrot.slane %v694_v15, 4  ;;  %v707_v45 = vadd.f32 %v706_v14, %v704_v16 }
 0x30c   :  { %v696_v51 = vadd.f32 %v695_v43, %v694_v15  ;;  %v708_v55 = vrot.slane %v707_v45, 4 }
 0x30e   :  { %v697_v17 = vrot.slane %v696_v51, 2  ;;  %v709_v18 = vadd.f32 %v708_v55, %v707_v45 }
 0x310   :  { %v698_v19 = vadd.f32 %v697_v17, %v696_v51  ;;  %v710_v20 = vrot.slane %v709_v18, 2 }
 0x312   :  { %v699_v21 = vrot.slane %v698_v19, 1  ;;  %v711_v22 = vadd.f32 %v710_v20, %v709_v18 }
 0x314   :  { %v712_v24 = vrot.slane %v711_v22, 1  ;;  %v700_v25 = vadd.f32 %v699_v21, %v698_v19 }
 0x316   :  { %v713_v27 = vadd.f32 %v712_v24, %v711_v22 }
 0x318   :  { %v714_v28 = vsel %vm221_vm2, %v700_v25, %v713_v27 }
 0x319   :  { %1047 = vmatmul.mubr.f32.vlgmr.msra.gmra.mrb[2].mxu1 %v714_v28 }
 0x3ec   :  { %v797_v30 = vpop.f32.mrb[2].mxu1 }
 0x3ed   :  { %v801_v31 = vmul.f32 %v797_v30, %v797_v30  ;;  %v1048_v33 = vpop.f32.mrb[3].mxu1 }
 0x3ef   :  { %v803_v34 = vrot.slane %v801_v31, 7 }
 0x3f1   :  { %v805_v36 = vsub.f32 %v797_v30, %v803_v34 }
 0x3f3   :  { %v806_v37 = vadd.f32 1e-05, %v805_v36 }
 0x3f5   :  { %1145 = vrsqrt.f32 %v806_v37 }
 0x3ff   :  { %v1146_v39 = vpop.eup %1145 }
 0x400   :  { %v809_v44 = vrot.slane %v1146_v39, 1 }
 0x402   :  { %v811_v46 = vmul.f32 %v809_v44, %v691_v40 }
 0x404   :  { %v812_v47 = vmul.f32 %v811_v46, %v797_v30  ;;  %v820_v48 = vrot.slane %v811_v46, %v327_v59 }
 0x406   :  { %v814_v49 = vrot.slane %v812_v47, 7  ;;  %v821_v52 = vmul.f32 %v820_v48, %v677_v61  ;;  %v822_v53 = vmul.f32 %v820_v48, %v680_v35  ;;  %v823_v56 = vmul.f32 %v820_v48, %v685_v7 }
 0x407   :  { %v824_v57 = vmul.f32 %v820_v48, %v688_v13 }
 0x408   :  { %v816_v50 = vsub.f32 %v691_v40, %v814_v49 }
 0x40a   :  { %v828_v10 = vrot.slane %v816_v50, %v335_v63 }
 0x40c   :  { %v829_v23 = vadd.f32 %v828_v10, %v821_v52  ;;  %v830_v26 = vadd.f32 %v828_v10, %v822_v53  ;;  %v831_v29 = vadd.f32 %v828_v10, %v823_v56  ;;  %v832_v41 = vadd.f32 %v828_v10, %v824_v57 }
 0x40e   :  { %v833_v58 = vmax.f32 %v829_v23, 0.0  ;;  %v834_v60 = vmax.f32 %v830_v26, 0.0  ;;  %v835_v32 = vmax.f32 %v831_v29, 0.0  ;;  %v836_v62 = vmax.f32 %v832_v41, 0.0 }
 0x410   :  { %837 = vst [vmem:[%s1482_s6] sm:$0xff] %v833_v58  ;;  %838 = vst [vmem:[%s1482_s6 + $0x8] sm:$0xff] %v834_v60 }
 0x411   :  { %839 = vst [vmem:[%s1482_s6 + $0x10] sm:$0xff] %v835_v32  ;;  %840 = vst [vmem:[%s1482_s6 + $0x18] sm:$0xff] %v836_v62 }

</bundles_post_ra>
